<compile_context>
chip_gen: v5e
topology: v5e:2x2
jax: 0.10.0
libtpu: 0.0.40
codegen_flags: <defaults>
</compile_context>

<pallas_src>
import functools

import jax
import jax.numpy as jnp
from jax.experimental import pallas as pl
from jax.experimental.pallas import tpu as pltpu


def _round_up(x, m):
    return (x + m - 1) // m * m


# ----------------------------------------------------------------------------
# Fused Pallas kernel: backbone Linear+ReLU and all task heads in one call.
#
#   rep = relu(x @ Wb + bb)        (bf16 operands, f32 MXU accumulation)
#   out = rep @ Wh_cat + bh_cat    (heads concatenated & lane-padded to 128)
#
# `rep` stays on-chip (vregs/VMEM) between the two matmuls; the concatenated,
# 128-lane-padded head output keeps the writeback a full unmasked store.
# ----------------------------------------------------------------------------
def _fused_mtl_kernel(x_ref, bw_ref, bb_ref, hw_ref, hb_ref, o_ref):
    # x_ref : [Bp, D]  bf16    bw_ref: [D, Hd]  bf16    bb_ref: [1, Hd] f32
    # hw_ref: [Hd, Np] bf16    hb_ref: [1, Np]  f32     o_ref : [Bp, Np] f32
    rep = jnp.dot(x_ref[...], bw_ref[...], preferred_element_type=jnp.float32)
    rep = jnp.maximum(rep + bb_ref[...], 0.0)                 # bias + ReLU in f32
    out = jnp.dot(rep.astype(hw_ref.dtype), hw_ref[...],
                  preferred_element_type=jnp.float32)
    out = out + hb_ref[...]
    o_ref[...] = out.astype(o_ref.dtype)


@functools.partial(jax.jit, static_argnames=("out_dims",))
def fused_mtl_forward(x_nchw, bw, bb, hw, hb, *, out_dims):
    """rep = relu(flatten(x) @ bw + bb); preds = split(rep @ hw + hb)."""
    B = x_nchw.shape[0]
    D, hidden = bw.shape
    n_pad = hw.shape[1]
    b_pad = _round_up(max(B, 8), 8)

    # glue: flatten NCHW -> [B, C*H*W] (row-major, matches torch.flatten(x, 1)),
    # cast to bf16 for the MXU, pad batch to a full sublane group.
    x2d = x_nchw.reshape(B, -1).astype(jnp.bfloat16)
    if b_pad != B:
        x2d = jnp.pad(x2d, ((0, b_pad - B), (0, 0)))

    cost = pl.CostEstimate(
        flops=2 * b_pad * D * hidden + 2 * b_pad * hidden * n_pad,
        transcendentals=0,
        bytes_accessed=(x2d.size * 2 + bw.size * 2 + hw.size * 2
                        + bb.size * 4 + hb.size * 4 + b_pad * n_pad * 4),
    )

    out = pl.pallas_call(
        _fused_mtl_kernel,
        out_shape=jax.ShapeDtypeStruct((b_pad, n_pad), jnp.float32),
        grid=(),
        in_specs=[
            pl.BlockSpec((b_pad, D), lambda: (0, 0)),
            pl.BlockSpec((D, hidden), lambda: (0, 0)),
            pl.BlockSpec((1, hidden), lambda: (0, 0)),
            pl.BlockSpec((hidden, n_pad), lambda: (0, 0)),
            pl.BlockSpec((1, n_pad), lambda: (0, 0)),
        ],
        out_specs=pl.BlockSpec((b_pad, n_pad), lambda: (0, 0)),
        compiler_params=pltpu.CompilerParams(
            dimension_semantics=(),
            vmem_limit_bytes=32 * 1024 * 1024,
        ),
        cost_estimate=cost,
    )(x2d, bw, bb, hw, hb)

    # slice away batch / lane padding and split per task (plain JAX glue)
    out = out[:B]
    preds, off = [], 0
    for od in out_dims:
        preds.append(out[:, off:off + od])
        off += od
    return preds


# ----------------------------------------------------------------------------
# VanillaMTL forward (inference semantics)
# ----------------------------------------------------------------------------
class VanillaMTLPallas:
    """JAX/Pallas equivalent of VanillaMTL.forward (eval mode).

    backbone(x) -> rep ; preds = [head_i(rep)] ; returns list of preds.
    """

    def __init__(self, in_dim, hidden, head_out_dims, key):
        self.head_out_dims = tuple(int(d) for d in head_out_dims)
        kb_w, kb_b, *head_keys = jax.random.split(key, 2 + 2 * len(head_out_dims))

        scale_b = 1.0 / jnp.sqrt(jnp.float32(in_dim))
        bw = jax.random.uniform(kb_w, (in_dim, hidden), jnp.float32, -1.0, 1.0) * scale_b
        bb = jax.random.uniform(kb_b, (1, hidden), jnp.float32, -1.0, 1.0) * scale_b

        scale_h = 1.0 / jnp.sqrt(jnp.float32(hidden))
        hws, hbs = [], []
        for i, od in enumerate(self.head_out_dims):
            kw, kbias = head_keys[2 * i], head_keys[2 * i + 1]
            hws.append(jax.random.uniform(kw, (hidden, od), jnp.float32, -1.0, 1.0) * scale_h)
            hbs.append(jax.random.uniform(kbias, (1, od), jnp.float32, -1.0, 1.0) * scale_h)

        # concatenate all heads and zero-pad the output axis to a multiple of 128
        n_total = sum(self.head_out_dims)
        n_pad = _round_up(max(n_total, 128), 128)
        hw_cat = jnp.pad(jnp.concatenate(hws, axis=1), ((0, 0), (0, n_pad - n_total)))
        hb_cat = jnp.pad(jnp.concatenate(hbs, axis=1), ((0, 0), (0, n_pad - n_total)))

        # bf16 weights for the MXU (halves the dominant weight DMA); biases stay f32.
        self.backbone_w = bw.astype(jnp.bfloat16)
        self.backbone_b = bb
        self.heads_w = hw_cat.astype(jnp.bfloat16)
        self.heads_b = hb_cat

    def __call__(self, x_nchw):
        # TODO(synk): training-mode detach/clone + register_hook are backward-only
        # gradient bookkeeping in the reference (no forward-value effect); omitted.
        return fused_mtl_forward(
            x_nchw, self.backbone_w, self.backbone_b,
            self.heads_w, self.heads_b, out_dims=self.head_out_dims)


if __name__ == "__main__":
    key = jax.random.PRNGKey(0)
    k_x, k_params = jax.random.split(key)

    # Input consistent with a scene-understanding style module: NCHW
    B, C, H, W = 2, 4, 16, 16
    x = jax.random.normal(k_x, (B, C, H, W), dtype=jnp.float32)

    in_dim = C * H * W          # 1024
    hidden = 32
    head_out_dims = (8, 16)     # two tasks

    model = VanillaMTLPallas(in_dim, hidden, head_out_dims, k_params)

    preds = model(x)
    preds = [jax.block_until_ready(p) for p in preds]

    # sanity: pure-JAX reference of the same bf16-input / f32-accumulate forward
    x2d_ref = x.reshape(B, -1).astype(jnp.bfloat16).astype(jnp.float32)
    bw32 = model.backbone_w.astype(jnp.float32)
    rep_ref = jnp.maximum(x2d_ref @ bw32 + model.backbone_b, 0.0)
    rep_ref = rep_ref.astype(jnp.bfloat16).astype(jnp.float32)
    full_ref = rep_ref @ model.heads_w.astype(jnp.float32) + model.heads_b

    off = 0
    for od, p in zip(head_out_dims, preds):
        ref = full_ref[:, off:off + od]
        off += od
        assert p.shape == (B, od)
        assert jnp.allclose(p, ref, atol=1e-2, rtol=1e-2)

    print("KERNEL_OK")
</pallas_src>

<mosaic_0001>
module attributes {stable_mosaic.version = 11 : i64} {
  func.func @_fused_mtl_kernel(%arg0: memref<8x1024xbf16, #tpu.memory_space<vmem>>, %arg1: memref<1024x32xbf16, #tpu.memory_space<vmem>>, %arg2: memref<1x32xf32, #tpu.memory_space<vmem>>, %arg3: memref<32x128xbf16, #tpu.memory_space<vmem>>, %arg4: memref<1x128xf32, #tpu.memory_space<vmem>>, %arg5: memref<8x128xf32, #tpu.memory_space<vmem>>) attributes {dimension_semantics = [], scalar_prefetch = 0 : i64, scratch_operands = 0 : i64, tpu.core_type = #tpu.core_type<tc>} {
    %c0 = arith.constant 0 : index
    %c0_0 = arith.constant 0 : index
    %0 = vector.load %arg0[%c0, %c0_0] : memref<8x1024xbf16, #tpu.memory_space<vmem>>, vector<8x1024xbf16>
    %c0_1 = arith.constant 0 : index
    %c0_2 = arith.constant 0 : index
    %1 = vector.load %arg1[%c0_1, %c0_2] : memref<1024x32xbf16, #tpu.memory_space<vmem>>, vector<1024x32xbf16>
    %cst = arith.constant dense<0.000000e+00> : vector<8x32xf32>
    %2 = tpu.matmul %0, %1, %cst {dimension_numbers = #tpu.dot_dimension_numbers<[1], [0], [0], [1], [0, 0, 1, 1], [], []>} : vector<8x1024xbf16>, vector<1024x32xbf16>, vector<8x32xf32> -> vector<8x32xf32>
    %c0_3 = arith.constant 0 : index
    %c0_4 = arith.constant 0 : index
    %3 = vector.load %arg2[%c0_3, %c0_4] : memref<1x32xf32, #tpu.memory_space<vmem>>, vector<1x32xf32>
    %4 = vector.broadcast %3 : vector<1x32xf32> to vector<8x32xf32>
    %5 = arith.addf %2, %4 : vector<8x32xf32>
    %cst_5 = arith.constant 0.000000e+00 : f32
    %6 = vector.broadcast %cst_5 : f32 to vector<8x32xf32>
    %7 = arith.maximumf %5, %6 : vector<8x32xf32>
    %8 = arith.truncf %7 : vector<8x32xf32> to vector<8x32xbf16>
    %c0_6 = arith.constant 0 : index
    %c0_7 = arith.constant 0 : index
    %9 = vector.load %arg3[%c0_6, %c0_7] : memref<32x128xbf16, #tpu.memory_space<vmem>>, vector<32x128xbf16>
    %cst_8 = arith.constant dense<0.000000e+00> : vector<8x128xf32>
    %10 = tpu.matmul %8, %9, %cst_8 {dimension_numbers = #tpu.dot_dimension_numbers<[1], [0], [0], [1], [0, 0, 1, 1], [], []>} : vector<8x32xbf16>, vector<32x128xbf16>, vector<8x128xf32> -> vector<8x128xf32>
    %c0_9 = arith.constant 0 : index
    %c0_10 = arith.constant 0 : index
    %11 = vector.load %arg4[%c0_9, %c0_10] : memref<1x128xf32, #tpu.memory_space<vmem>>, vector<1x128xf32>
    %12 = vector.broadcast %11 : vector<1x128xf32> to vector<8x128xf32>
    %13 = arith.addf %10, %12 : vector<8x128xf32>
    %c0_11 = arith.constant 0 : index
    %c0_12 = arith.constant 0 : index
    %14 = vector.load %arg5[%c0_11, %c0_12] : memref<8x128xf32, #tpu.memory_space<vmem>>, vector<8x128xf32>
    tpu.vector_store %arg5[%c0_11, %c0_12], %13 {strides = array<i32>} : memref<8x128xf32, #tpu.memory_space<vmem>>, vector<8x128xf32>,
    return
  }
}

</mosaic_0001>

<bundles_post_ra>
// kernel: fused_mtl_forward.1
= control target key start
LH: loop header
LB: loop body
LE: loop exit
PB: predicated region body
PF: predicated region fallthrough
CT: control target
= control target key end

     0   :  { %vm695_vm0 = vcmask 261120   ;;  %s1299_s1 = inlined_call_operand.vmem [shape: bf16[1024,32], index: 1, kind: input, shape index: {}]   ;;  %s1300_s2 = inlined_call_operand.vmem [shape: f32[1,32], index: 2, kind: input, shape index: {}]   ;;  %s1301_s0 = inlined_call_operand.vmem [shape: bf16[8,1024], index: 0, kind: input, shape index: {}]   ;;  %s1302_s4 = inlined_call_operand.vmem [shape: f32[1,128], index: 4, kind: input, shape index: {}]   ;;  %s1303_s3 = inlined_call_operand.vmem [shape: bf16[32,128], index: 3, kind: input, shape index: {}]   ;;  %s1304_s5 = inlined_call_operand.vmem [shape: f32[8,128], index: 5, kind: output, shape index: {}]  }
   0x1   :  { %v989_v0 = vld [vmem:[%s1299_s1 + $0x38] sm:$0xff]  ;;  %v988_v4 = vld [vmem:[%s1299_s1 + $0x30] sm:$0xff]  ;;  %v987_v8 = vld [vmem:[%s1299_s1 + $0x28] sm:$0xff] }
   0x2   :  { %v997_v1 = vld [vmem:[%s1299_s1 + $0x78] sm:$0xff]  ;;  %569 = vmatpush.bf16.msra.mxu0 %v989_v0  ;;  %v996_v5 = vld [vmem:[%s1299_s1 + $0x70] sm:$0xff]  ;;  %v995_v9 = vld [vmem:[%s1299_s1 + $0x68] sm:$0xff] }
   0x3   :  { %v1005_v2 = vld [vmem:[%s1299_s1 + $0xb8] sm:$0xff]  ;;  %582 = vmatpush.bf16.msra.mxu1 %v997_v1  ;;  %v1004_v6 = vld [vmem:[%s1299_s1 + $0xb0] sm:$0xff]  ;;  %v1003_v10 = vld [vmem:[%s1299_s1 + $0xa8] sm:$0xff] }
   0x4   :  { %v1013_v3 = vld [vmem:[%s1299_s1 + $0xf8] sm:$0xff]  ;;  %595 = vmatpush.bf16.msra.mxu2 %v1005_v2  ;;  %v1012_v7 = vld [vmem:[%s1299_s1 + $0xf0] sm:$0xff]  ;;  %v1011_v11 = vld [vmem:[%s1299_s1 + $0xe8] sm:$0xff] }
   0x5   :  { %608 = vmatpush.bf16.msra.mxu3 %v1013_v3  ;;  %v986_v12 = vld [vmem:[%s1299_s1 + $0x20] sm:$0xff]  ;;  %v985_v16 = vld [vmem:[%s1299_s1 + $0x18] sm:$0xff]  ;;  %v984_v20 = vld [vmem:[%s1299_s1 + $0x10] sm:$0xff] }
   0x6   :  { %570 = vmatpush.bf16.msra.mxu0 %v988_v4  ;;  %v994_v13 = vld [vmem:[%s1299_s1 + $0x60] sm:$0xff]  ;;  %v993_v17 = vld [vmem:[%s1299_s1 + $0x58] sm:$0xff]  ;;  %v992_v21 = vld [vmem:[%s1299_s1 + $0x50] sm:$0xff] }
   0x7   :  { %583 = vmatpush.bf16.msra.mxu1 %v996_v5  ;;  %v1002_v14 = vld [vmem:[%s1299_s1 + $0xa0] sm:$0xff]  ;;  %v1001_v18 = vld [vmem:[%s1299_s1 + $0x98] sm:$0xff]  ;;  %v1000_v22 = vld [vmem:[%s1299_s1 + $0x90] sm:$0xff] }
   0x8   :  { %596 = vmatpush.bf16.msra.mxu2 %v1004_v6  ;;  %v1010_v15 = vld [vmem:[%s1299_s1 + $0xe0] sm:$0xff]  ;;  %v1009_v19 = vld [vmem:[%s1299_s1 + $0xd8] sm:$0xff]  ;;  %v1008_v23 = vld [vmem:[%s1299_s1 + $0xd0] sm:$0xff] }
   0x9   :  { %609 = vmatpush.bf16.msra.mxu3 %v1012_v7  ;;  %v983_v24 = vld [vmem:[%s1299_s1 + $0x8] sm:$0xff]  ;;  %v21_v29 = vld [vmem:[%s1301_s0] sm:$0xff]  ;;  %v1021_v38 = vld [vmem:[%s1299_s1 + $0x138] sm:$0xff] }
   0xa   :  { %571 = vmatpush.bf16.msra.mxu0 %v987_v8  ;;  %v991_v25 = vld [vmem:[%s1299_s1 + $0x48] sm:$0xff]  ;;  %v982_v30 = vld [vmem:[%s1299_s1] sm:$0xff]  ;;  %v161_v33 = vunpack.c.l.b16 %v21_v29  ;;  %v162_v37 = vunpack.c.h.b16 %v21_v29  ;;  %v1029_v39 = vld [vmem:[%s1299_s1 + $0x178] sm:$0xff] }
   0xb   :  { %584 = vmatpush.bf16.msra.mxu1 %v995_v9  ;;  %v999_v26 = vld [vmem:[%s1299_s1 + $0x88] sm:$0xff]  ;;  %v990_v31 = vld [vmem:[%s1299_s1 + $0x40] sm:$0xff]  ;;  %v1037_v40 = vld [vmem:[%s1299_s1 + $0x1b8] sm:$0xff] }
   0xc   :  { %597 = vmatpush.bf16.msra.mxu2 %v1003_v10  ;;  %v1007_v27 = vld [vmem:[%s1299_s1 + $0xc8] sm:$0xff]  ;;  %v998_v34 = vld [vmem:[%s1299_s1 + $0x80] sm:$0xff]  ;;  %v1045_v41 = vld [vmem:[%s1299_s1 + $0x1f8] sm:$0xff]  ;;  %v169_v43 = vpack.c.b16 %v161_v33, %v161_v33  ;;  %v170_v45 = vpack.c.b16 %v162_v37, %v162_v37 }
   0xd   :  { %610 = vmatpush.bf16.msra.mxu3 %v1011_v11  ;;  %v22_v28 = vld [vmem:[%s1301_s0 + $0x8] sm:$0xff]  ;;  %v1006_v35 = vld [vmem:[%s1299_s1 + $0xc0] sm:$0xff]  ;;  %v1020_v46 = vld [vmem:[%s1299_s1 + $0x130] sm:$0xff] }
   0xe   :  { %572 = vmatpush.bf16.msra.mxu0 %v986_v12  ;;  %v163_v32 = vunpack.c.l.b16 %v22_v28  ;;  %v164_v36 = vunpack.c.h.b16 %v22_v28  ;;  %v1028_v47 = vld [vmem:[%s1299_s1 + $0x170] sm:$0xff]  ;;  %v1019_v50 = vld [vmem:[%s1299_s1 + $0x128] sm:$0xff]  ;;  %v1018_v54 = vld [vmem:[%s1299_s1 + $0x120] sm:$0xff] }
   0xf   :  { %585 = vmatpush.bf16.msra.mxu1 %v994_v13  ;;  %v1036_v48 = vld [vmem:[%s1299_s1 + $0x1b0] sm:$0xff]  ;;  %v1027_v51 = vld [vmem:[%s1299_s1 + $0x168] sm:$0xff]  ;;  %v1026_v55 = vld [vmem:[%s1299_s1 + $0x160] sm:$0xff] }
  0x10   :  { %598 = vmatpush.bf16.msra.mxu2 %v1002_v14  ;;  %v171_v42 = vpack.c.b16 %v163_v32, %v163_v32  ;;  %v172_v44 = vpack.c.b16 %v164_v36, %v164_v36  ;;  %v1044_v49 = vld [vmem:[%s1299_s1 + $0x1f0] sm:$0xff]  ;;  %v1035_v52 = vld [vmem:[%s1299_s1 + $0x1a8] sm:$0xff]  ;;  %v1034_v56 = vld [vmem:[%s1299_s1 + $0x1a0] sm:$0xff] }
  0x11   :  { %611 = vmatpush.bf16.msra.mxu3 %v1010_v15  ;;  %v1043_v53 = vld [vmem:[%s1299_s1 + $0x1e8] sm:$0xff]  ;;  %v1042_v57 = vld [vmem:[%s1299_s1 + $0x1e0] sm:$0xff]  ;;  %v1017_v58 = vld [vmem:[%s1299_s1 + $0x118] sm:$0xff] }
  0x12   :  { %573 = vmatpush.bf16.msra.mxu0 %v985_v16  ;;  %v1025_v59 = vld [vmem:[%s1299_s1 + $0x158] sm:$0xff]  ;;  %v1016_v62 = vld [vmem:[%s1299_s1 + $0x110] sm:$0xff]  ;;  %v1015_v2 = vld [vmem:[%s1299_s1 + $0x108] sm:$0xff] }
  0x13   :  { %586 = vmatpush.bf16.msra.mxu1 %v993_v17  ;;  %v1033_v60 = vld [vmem:[%s1299_s1 + $0x198] sm:$0xff]  ;;  %v1024_v63 = vld [vmem:[%s1299_s1 + $0x150] sm:$0xff]  ;;  %v1023_v3 = vld [vmem:[%s1299_s1 + $0x148] sm:$0xff] }
  0x14   :  { %599 = vmatpush.bf16.msra.mxu2 %v1001_v18  ;;  %v1041_v61 = vld [vmem:[%s1299_s1 + $0x1d8] sm:$0xff]  ;;  %v1032_v0 = vld [vmem:[%s1299_s1 + $0x190] sm:$0xff]  ;;  %v1031_v5 = vld [vmem:[%s1299_s1 + $0x188] sm:$0xff] }
  0x15   :  { %612 = vmatpush.bf16.msra.mxu3 %v1009_v19  ;;  %v1040_v1 = vld [vmem:[%s1299_s1 + $0x1d0] sm:$0xff]  ;;  %v1039_v6 = vld [vmem:[%s1299_s1 + $0x1c8] sm:$0xff]  ;;  %v24_v7 = vld [vmem:[%s1301_s0 + $0x18] sm:$0xff] }
  0x16   :  { %574 = vmatpush.bf16.msra.mxu0 %v984_v20  ;;  %v23_v4 = vld [vmem:[%s1301_s0 + $0x10] sm:$0xff]  ;;  %v1014_v10 = vld [vmem:[%s1299_s1 + $0x100] sm:$0xff]  ;;  %v167_v12 = vunpack.c.l.b16 %v24_v7  ;;  %v168_v13 = vunpack.c.h.b16 %v24_v7  ;;  %v1047_v20 = vld [vmem:[%s1303_s3 + $0x8] sm:$0xff] }
  0x17   :  { %587 = vmatpush.bf16.msra.mxu1 %v992_v21  ;;  %v165_v8 = vunpack.c.l.b16 %v23_v4  ;;  %v166_v9 = vunpack.c.h.b16 %v23_v4  ;;  %v1022_v11 = vld [vmem:[%s1299_s1 + $0x140] sm:$0xff] }
  0x18   :  { %600 = vmatpush.bf16.msra.mxu2 %v1000_v22  ;;  %v1030_v14 = vld [vmem:[%s1299_s1 + $0x180] sm:$0xff]  ;;  %v175_v18 = vpack.c.b16 %v167_v12, %v167_v12  ;;  %v176_v19 = vpack.c.b16 %v168_v13, %v168_v13 }
  0x19   :  { %613 = vmatpush.bf16.msra.mxu3 %v1008_v23  ;;  %v1038_v15 = vld [vmem:[%s1299_s1 + $0x1c0] sm:$0xff]  ;;  %v173_v16 = vpack.c.b16 %v165_v8, %v165_v8  ;;  %v174_v17 = vpack.c.b16 %v166_v9, %v166_v9 }
  0x1a   :  { %575 = vmatpush.bf16.msra.mxu0 %v983_v24  ;;  %v1048_v28 = vld [vmem:[%s1300_s2] ss:$0 sm:$0xff] }
  0x1b   :  { %588 = vmatpush.bf16.msra.mxu1 %v991_v25 }
  0x1c   :  { %601 = vmatpush.bf16.msra.mxu2 %v999_v26  ;;  %v1046_v26 = vld [vmem:[%s1303_s3] sm:$0xff] }
  0x1d   :  { %614 = vmatpush.bf16.msra.mxu3 %v1007_v27 }
  0x1e   :  { %576 = vmatpush.bf16.msra.mxu0 %v982_v30 }
  0x1f   :  { %589 = vmatpush.bf16.msra.mxu1 %v990_v31 }
  0x20   :  { %602 = vmatpush.bf16.msra.mxu2 %v998_v34 }
  0x21   :  { %615 = vmatpush.bf16.msra.mxu3 %v1006_v35  ;;  %577 = vmatmul.bf16.vlgmr.msra.gmra.mxu0 %v169_v43 }
  0x22   :  { %621 = vmatpush.bf16.msrb.mxu0 %v1021_v38  ;;  %590 = vmatmul.bf16.vlgmr.msra.gmra.mxu1 %v170_v45 }
  0x23   :  { %634 = vmatpush.bf16.msrb.mxu1 %v1029_v39  ;;  %603 = vmatmul.bf16.vlgmr.msra.gmra.mxu2 %v171_v42 }
  0x24   :  { %647 = vmatpush.bf16.msrb.mxu2 %v1037_v40  ;;  %616 = vmatmul.bf16.vlgmr.msra.gmra.mxu3 %v172_v44 }
  0x25   :  { %660 = vmatpush.bf16.msrb.mxu3 %v1045_v41 }
  0x26   :  { %622 = vmatpush.bf16.msrb.mxu0 %v1020_v46 }
  0x27   :  { %635 = vmatpush.bf16.msrb.mxu1 %v1028_v47 }
  0x28   :  { %648 = vmatpush.bf16.msrb.mxu2 %v1036_v48 }
  0x29   :  { %661 = vmatpush.bf16.msrb.mxu3 %v1044_v49  ;;  %v1049_v49 = vld [vmem:[%s1302_s4] ss:$0 sm:$0xff] }
  0x2a   :  { %623 = vmatpush.bf16.msrb.mxu0 %v1019_v50 }
  0x2b   :  { %636 = vmatpush.bf16.msrb.mxu1 %v1027_v51 }
  0x2c   :  { %649 = vmatpush.bf16.msrb.mxu2 %v1035_v52 }
  0x2d   :  { %662 = vmatpush.bf16.msrb.mxu3 %v1043_v53 }
  0x2e   :  { %624 = vmatpush.bf16.msrb.mxu0 %v1018_v54 }
  0x2f   :  { %637 = vmatpush.bf16.msrb.mxu1 %v1026_v55 }
  0x30   :  { %650 = vmatpush.bf16.msrb.mxu2 %v1034_v56 }
  0x31   :  { %663 = vmatpush.bf16.msrb.mxu3 %v1042_v57 }
  0x32   :  { %625 = vmatpush.bf16.msrb.mxu0 %v1017_v58 }
  0x33   :  { %638 = vmatpush.bf16.msrb.mxu1 %v1025_v59 }
  0x34   :  { %651 = vmatpush.bf16.msrb.mxu2 %v1033_v60 }
  0x35   :  { %664 = vmatpush.bf16.msrb.mxu3 %v1041_v61 }
  0x36   :  { %626 = vmatpush.bf16.msrb.mxu0 %v1016_v62 }
  0x37   :  { %639 = vmatpush.bf16.msrb.mxu1 %v1024_v63 }
  0x38   :  { %652 = vmatpush.bf16.msrb.mxu2 %v1032_v0 }
  0x39   :  { %665 = vmatpush.bf16.msrb.mxu3 %v1040_v1 }
  0x3a   :  { %627 = vmatpush.bf16.msrb.mxu0 %v1015_v2 }
  0x3b   :  { %640 = vmatpush.bf16.msrb.mxu1 %v1023_v3 }
  0x3c   :  { %653 = vmatpush.bf16.msrb.mxu2 %v1031_v5 }
  0x3d   :  { %666 = vmatpush.bf16.msrb.mxu3 %v1039_v6 }
  0x3e   :  { %628 = vmatpush.bf16.msrb.mxu0 %v1014_v10 }
  0x3f   :  { %641 = vmatpush.bf16.msrb.mxu1 %v1022_v11 }
  0x40   :  { %654 = vmatpush.bf16.msrb.mxu2 %v1030_v14 }
  0x41   :  { %667 = vmatpush.bf16.msrb.mxu3 %v1038_v15  ;;  %629 = vmatmul.bf16.vlgmr.msrb.gmra.mxu0 %v173_v16 }
  0x42   :  { %642 = vmatmul.bf16.vlgmr.msrb.gmra.mxu1 %v174_v17  ;;  %705 = vmatpush.bf16.msra.mxu0 %v1047_v20 }
  0x43   :  { %655 = vmatmul.bf16.vlgmr.msrb.gmra.mxu2 %v175_v18 }
  0x44   :  { %668 = vmatmul.bf16.vlgmr.msrb.gmra.mxu3 %v176_v19 }
  0x46   :  { %706 = vmatpush.bf16.msra.mxu0 %v1046_v26 }
  0x9e   :  { %v578_v21 = vpop.f32.mrf.mxu0 }
  0x9f   :  { %v591_v22 = vpop.f32.mrf.mxu1  ;;  %v579_v31 = vadd.f32 %v1048_v28, %v578_v21 }
  0xa1   :  { %v592_v32 = vadd.f32 %v591_v22, %v579_v31 }
  0xa6   :  { %v604_v23 = vpop.f32.mrf.mxu2  ;;  %v580_v25 = vpop.f32.mrf.mxu0 }
  0xa7   :  { %v617_v24 = vpop.f32.mrf.mxu3  ;;  %v593_v27 = vpop.f32.mrf.mxu1  ;;  %v605_v33 = vadd.f32 %v604_v23, %v592_v32 }
  0xa9   :  { %v618_v34 = vadd.f32 %v617_v24, %v605_v33 }
  0xae   :  { %v606_v29 = vpop.f32.mrf.mxu2 }
  0xaf   :  { %v619_v30 = vpop.f32.mrf.mxu3 }
  0xbe   :  { %v630_v35 = vpop.f32.mrf.mxu0 }
  0xbf   :  { %v643_v36 = vpop.f32.mrf.mxu1  ;;  %v631_v37 = vadd.f32 %v630_v35, %v618_v34 }
  0xc1   :  { %v644_v38 = vadd.f32 %v643_v36, %v631_v37 }
  0xc6   :  { %v656_v39 = vpop.f32.mrf.mxu2  ;;  %v632_v42 = vpop.f32.mrf.mxu0 }
  0xc7   :  { %v669_v40 = vpop.f32.mrf.mxu3  ;;  %v657_v41 = vadd.f32 %v656_v39, %v644_v38  ;;  %v645_v43 = vpop.f32.mrf.mxu1 }
  0xc9   :  { %v670_v44 = vadd.f32 %v669_v40, %v657_v41 }
  0xcb   :  { %v673_v45 = vmax.f32 %v670_v44, 0.0 }
  0xcd   :  { %v674_v46 = vpack.c.bf16 %v673_v45, %v673_v45 }
  0xce   :  { %v658_v47 = vpop.f32.mrf.mxu2 }
  0xcf   :  { %v671_v48 = vpop.f32.mrf.mxu3  ;;  %981 = vmatmul.msk.bf16.vlgmr.msra.gmra.mxu0 %vm695_vm0, %v674_v46 }
 0x14c   :  { %v708_v50 = vpop.f32.mrf.mxu0 }
 0x14d   :  { %v709_v51 = vadd.f32 %v1049_v49, %v708_v50 }
 0x14f   :  { %712 = vst [vmem:[%s1304_s5] sm:$0xff] %v709_v51 }
 0x154   :  { %v710_v52 = vpop.f32.mrf.mxu0 }

</bundles_post_ra>
